<compile_context>
chip_gen: v5e
topology: v5e:2x2
jax: 0.10.0
libtpu: 0.0.40
codegen_flags: <defaults>
</compile_context>

<pallas_src>
import functools

import jax
import jax.numpy as jnp
from jax import lax
from jax.experimental import pallas as pl
from jax.experimental.pallas import tpu as pltpu

T_DEFAULT = 4.0  # distillation temperature (module __init__ argument)

_SUBLANE = 8
_LANE = 128
_MAX_ROW_TILE = 8192


def _round_up(x, m):
    return ((x + m - 1) // m) * m


def _vmem_capacity_bytes():
    try:
        return int(pltpu.get_tpu_info().vmem_capacity_bytes)
    except Exception:
        return 64 << 20  # conservative fallback (v7x per-TensorCore VMEM)


def _make_kernel(num_rows, row_tile, need_mask):
    """Per-block kernel: fold (row_tile, C) squared diffs into an (8, C) partial."""

    def kernel(ys_ref, yt_ref, out_ref):
        diff = ys_ref[...].astype(jnp.float32) - yt_ref[...].astype(jnp.float32)
        if need_mask:
            # Ragged batch: rows >= num_rows of the (last, partial) block hold
            # whatever was in the VMEM buffer -> zero them before squaring.
            row0 = pl.program_id(0) * row_tile
            row_ids = lax.broadcasted_iota(jnp.int32, diff.shape, 0) + row0
            diff = jnp.where(row_ids < num_rows, diff, 0.0)
        sq = diff * diff
        rt, c = sq.shape
        # Fold row groups onto one (8, C) slab: the reshape only splits the
        # sublane axis at tile granularity (8), so the reduction is vreg-wise
        # VPU adds (no cross-lane XLU work, no lane-alignment requirement on C).
        out_ref[0] = sq.reshape(rt // _SUBLANE, _SUBLANE, c).sum(axis=0)

    return kernel


@functools.partial(jax.jit, static_argnames=("T",))
def distill_kl_loss(y_s, y_t, T=T_DEFAULT):
    """mean(((y_s - y_t) / T)**2) via a Pallas streaming-reduction kernel."""
    assert y_s.shape == y_t.shape, (y_s.shape, y_t.shape)
    B, C = y_s.shape
    itemsize = jnp.dtype(y_s.dtype).itemsize

    # ---- tile selection (bandwidth bound: biggest block that fits VMEM) ----
    vmem_cap = _vmem_capacity_bytes()
    target_block_bytes = (4 << 20) if vmem_cap >= (128 << 20) else (2 << 20)

    row_bytes_f32 = C * 4  # size the tile by its f32 footprint (temporaries)
    max_rows = (target_block_bytes // row_bytes_f32) // _SUBLANE * _SUBLANE
    max_rows = max(_SUBLANE, min(_MAX_ROW_TILE, max_rows))

    num_blocks = pl.cdiv(B, max_rows)
    # v7x megacore: the single "parallel" grid axis shards across both
    # TensorCores; ensure >= 2 blocks (prefer an even count) so neither core
    # idles.  No effect on v5e/v6e (1 TC).
    if num_blocks == 1 and B >= 2 * _SUBLANE:
        num_blocks = 2
    elif num_blocks > 1 and num_blocks % 2 == 1 and B >= (num_blocks + 1) * _SUBLANE:
        num_blocks += 1
    row_tile = _round_up(pl.cdiv(B, num_blocks), _SUBLANE)
    num_blocks = pl.cdiv(B, row_tile)  # never emit a fully-empty trailing block

    need_mask = (B % row_tile) != 0  # only the last block can be ragged

    # ---- VMEM budget: inputs (double-buffered) + f32 temporaries + output ----
    in_block_bytes = row_tile * C * itemsize
    f32_block_bytes = row_tile * C * 4
    vmem_limit = int(
        2 * 2 * in_block_bytes          # 2 inputs x 2 pipeline buffers
        + 6 * f32_block_bytes           # upcast / diff / mask / square temporaries
        + 2 * _SUBLANE * C * 4          # (8, C) output double buffer
        + (4 << 20)                     # headroom
    )
    vmem_limit = min(vmem_limit, (vmem_cap * 3) // 4)

    kernel = _make_kernel(B, row_tile, need_mask)

    partials = pl.pallas_call(
        kernel,
        out_shape=jax.ShapeDtypeStruct((num_blocks, _SUBLANE, C), jnp.float32),
        grid_spec=pltpu.PrefetchScalarGridSpec(
            num_scalar_prefetch=0,
            grid=(num_blocks,),
            in_specs=[
                # Full-extent class dim: no HBM-side padding / copies even when
                # C is not a multiple of 128.
                pl.BlockSpec((row_tile, C), lambda i: (i, 0)),
                pl.BlockSpec((row_tile, C), lambda i: (i, 0)),
            ],
            out_specs=pl.BlockSpec((1, _SUBLANE, C), lambda i: (i, 0, 0)),
        ),
        compiler_params=pltpu.CompilerParams(
            dimension_semantics=("parallel",),  # independent per-block partials
            vmem_limit_bytes=vmem_limit,
        ),
    )(y_s, y_t)

    # Tiny final reduction + fold-in of the 1/T^2 and mean normalization
    # (divide by the ORIGINAL element count; masked rows contributed zero).
    return jnp.sum(partials) / jnp.float32(B * C * T * T)


def distill_kl_ref(y_s, y_t, T=T_DEFAULT):
    p_s = y_s.astype(jnp.float32) / T
    p_t = y_t.astype(jnp.float32) / T
    return jnp.mean((p_s - p_t) ** 2)


if __name__ == "__main__":
    key = jax.random.PRNGKey(0)
    k1, k2, k3, k4, k5, k6 = jax.random.split(key, 6)

    # Small, tile-aligned logits.
    y_s = jax.random.normal(k1, (8, 128), dtype=jnp.float32)
    y_t = jax.random.normal(k2, (8, 128), dtype=jnp.float32)
    loss = jax.block_until_ready(distill_kl_loss(y_s, y_t))
    ref = distill_kl_ref(y_s, y_t)
    assert jnp.allclose(loss, ref, rtol=1e-5, atol=1e-6), (loss, ref)

    # Ragged batch + non-128-multiple class count + bf16 inputs
    # (exercises in-kernel row masking, full-extent class block, f32 upcast).
    y_s2 = jax.random.normal(k3, (10, 100), dtype=jnp.bfloat16)
    y_t2 = jax.random.normal(k4, (10, 100), dtype=jnp.bfloat16)
    loss2 = jax.block_until_ready(distill_kl_loss(y_s2, y_t2))
    ref2 = distill_kl_ref(y_s2, y_t2)
    assert jnp.allclose(loss2, ref2, rtol=1e-2, atol=1e-4), (loss2, ref2)

    # Multi-block grid (exercises the >= 2-block / megacore-sharding path).
    y_s3 = jax.random.normal(k5, (64, 40), dtype=jnp.float32)
    y_t3 = jax.random.normal(k6, (64, 40), dtype=jnp.float32)
    loss3 = jax.block_until_ready(distill_kl_loss(y_s3, y_t3))
    ref3 = distill_kl_ref(y_s3, y_t3)
    assert jnp.allclose(loss3, ref3, rtol=1e-5, atol=1e-6), (loss3, ref3)

    print("KERNEL_OK")
</pallas_src>

<mosaic_0001>
module attributes {stable_mosaic.version = 11 : i64} {
  func.func @kernel(%arg0: i32, %arg1: memref<8x128xf32, #tpu.memory_space<vmem>>, %arg2: memref<8x128xf32, #tpu.memory_space<vmem>>, %arg3: memref<1x8x128xf32, #tpu.memory_space<vmem>>) attributes {dimension_semantics = [#tpu.dimension_semantics<parallel>], iteration_bounds = array<i64: 1>, scalar_prefetch = 0 : i64, scratch_operands = 0 : i64, tpu.core_type = #tpu.core_type<tc>, window_params = [{transform_indices = @transform_0, window_bounds = array<i64: 8, 128>}, {transform_indices = @transform_1, window_bounds = array<i64: 8, 128>}, {transform_indices = @transform_2, window_bounds = array<i64: 1, 8, 128>}]} {
    %c0 = arith.constant 0 : index
    %c0_0 = arith.constant 0 : index
    %0 = vector.load %arg1[%c0, %c0_0] : memref<8x128xf32, #tpu.memory_space<vmem>>, vector<8x128xf32>
    %c0_1 = arith.constant 0 : index
    %c0_2 = arith.constant 0 : index
    %1 = vector.load %arg2[%c0_1, %c0_2] : memref<8x128xf32, #tpu.memory_space<vmem>>, vector<8x128xf32>
    %2 = arith.subf %0, %1 : vector<8x128xf32>
    %3 = arith.mulf %2, %2 : vector<8x128xf32>
    %4 = vector.shape_cast %3 : vector<8x128xf32> to vector<1x8x128xf32>
    %cst = arith.constant dense<0.000000e+00> : vector<8x128xf32>
    %5 = vector.multi_reduction <add>, %4, %cst [0] : vector<1x8x128xf32> to vector<8x128xf32>
    %c0_3 = arith.constant 0 : index
    %c0_4 = arith.constant 0 : index
    %c0_5 = arith.constant 0 : index
    %6 = vector.load %arg3[%c0_3, %c0_4, %c0_5] : memref<1x8x128xf32, #tpu.memory_space<vmem>>, vector<1x8x128xf32>
    %7 = vector.shape_cast %6 : vector<1x8x128xf32> to vector<8x128xf32>
    %8 = vector.shape_cast %5 : vector<8x128xf32> to vector<1x8x128xf32>
    tpu.vector_store %arg3[%c0_3, %c0_4, %c0_5], %8 {strides = array<i32>} : memref<1x8x128xf32, #tpu.memory_space<vmem>>, vector<1x8x128xf32>,
    return
  }
  func.func @transform_0(%arg0: i32) -> (i32, i32) {
    %c0_i32 = arith.constant 0 : i32
    %c0_i32_0 = arith.constant 0 : i32
    return %arg0, %c0_i32 : i32, i32
  }
  func.func @transform_1(%arg0: i32) -> (i32, i32) {
    %c0_i32 = arith.constant 0 : i32
    %c0_i32_0 = arith.constant 0 : i32
    return %arg0, %c0_i32 : i32, i32
  }
  func.func @transform_2(%arg0: i32) -> (i32, i32, i32) {
    %c0_i32 = arith.constant 0 : i32
    %c0_i32_0 = arith.constant 0 : i32
    %c0_i32_1 = arith.constant 0 : i32
    return %arg0, %c0_i32, %c0_i32_0 : i32, i32, i32
  }
}

</mosaic_0001>

<bundles_post_ra>
// kernel: distill_kl_loss.1
= control target key start
LH: loop header
LB: loop body
LE: loop exit
PB: predicated region body
PF: predicated region fallthrough
CT: control target
= control target key end

     0   :  { %7 = vsyncpa [#allocation3], 0  ;;  %s131_s0 = inlined_call_operand.hbm [shape: f32[8,128], index: 0, kind: input, shape index: {}]   ;;  %s132_s1 = inlined_call_operand.hbm [shape: f32[8,128], index: 1, kind: input, shape index: {}]   ;;  %s133_s2 = inlined_call_operand.vmem [shape: f32[1,8,128], index: 2, kind: output, shape index: {}]  }
   0x1   :  { %s14_s11 = sshll.u32 %s131_s0, 4  ;;  %s15_s11 = int_to_ptr.hbm [resolvable:$true] %s14_s11 }
   0x2   :  { %8 = vsyncpa [#allocation5], 0  ;;  %s105_s12 = smov [#allocation2]   ;;  %s25_s16 = sshll.u32 %s132_s1, 4  ;;  %s26_s16 = int_to_ptr.hbm [resolvable:$true] %s25_s16 }
   0x3   :  { %s16_s13 = sshll.u32 %s105_s12, 4  ;;  %s106_s17 = smov [#allocation4]   ;;  %s17_s13 = int_to_ptr.vmem [resolvable:$true] %s16_s13 }
   0x4   :  { %19 = dma.hbm_to_vmem [thread:$0]  %s15_s11, 128, %s17_s13, [#allocation3]  }
   0x5   :  { %s27_s18 = sshll.u32 %s106_s17, 4  ;;  %s28_s18 = int_to_ptr.vmem [resolvable:$true] %s27_s18 }
   0x6   :  { %30 = dma.hbm_to_vmem [thread:$0]  %s26_s16, 128, %s28_s18, [#allocation5]  }
   0x7   :  { %101 = dma.done.wait [#allocation3], 128  }
   0x8   :  { %102 = vsyncadd [#allocation3], 4294967168 }
   0x9   :  { %103 = dma.done.wait [#allocation5], 128  }
   0xa   :  { %104 = vsyncadd [#allocation5], 4294967168  ;;  %v39_v0 = vld [vmem:[#allocation2] sm:$0xff]  ;;  %v40_v1 = vld [vmem:[#allocation4] sm:$0xff] }
   0xb   :  { %v41_v2 = vsub.f32 %v39_v0, %v40_v1 }
   0xd   :  { %v42_v3 = vmul.f32 %v41_v2, %v41_v2 }
   0xf   :  { %44 = vst [vmem:[%s133_s2] sm:$0xff] %v42_v3 }
  0x10   :  { %49 = vsyncpa [#allocation3], 1 }
  0x11   :  { %50 = vsyncpa [#allocation5], 1 }

</bundles_post_ra>
